<compile_context>
chip_gen: v6e
topology: v6e:2x2x1
jax: 0.10.0
libtpu: 0.0.40
codegen_flags: <defaults>
</compile_context>

<pallas_src>
import functools

import jax
import jax.numpy as jnp
from jax.experimental import pallas as pl
from jax.experimental.pallas import tpu as pltpu

LANE = 128           # TPU lane width; feature dims padded to a multiple of this
SEM_HIDDEN = 128     # SemanticAttention hidden size (nn.Linear(in, 128)), lane aligned
TILE_M = 256         # dst/row tile (v5e/v6e: 256; prefer 128 on v7x, 64 MiB VMEM)
COMBINE_TILE = 512   # row tile for the mem-bound combine / predict kernels
VMEM_LIMIT = 48 * 1024 * 1024   # <= v7x's 64 MiB physical; raise to 96 MiB on v5e/v6e

# All matmul operands are kept in f32 because the fallback interpret/CPU dot
# path used by the test sandbox rejects BF16 x BF16 = F32.  On real TPU flip
# this to jnp.bfloat16: operands halve, accumulation stays f32.
COMPUTE_DTYPE = jnp.float32


def _round_up(x, m):
    return ((x + m - 1) // m) * m


def _elu(x):
    return jnp.where(x > 0, x, jnp.expm1(jnp.minimum(x, 0.0)))


# --------------------------------------------------------------------------
# Kernel 1: per-metapath FC projection  z = h @ W  (hoisted out of the
# attention dst-tile grid).  grid = (metapath m, row tile i), both parallel.
# --------------------------------------------------------------------------
def _proj_kernel(h_ref, w_ref, z_ref):
    z_ref[0] = jnp.dot(h_ref[...], w_ref[0],
                       preferred_element_type=jnp.float32).astype(z_ref.dtype)


def project(h_pad, w_p, *, tile_m):
    M, Fp, KDp = w_p.shape
    Np = h_pad.shape[0]
    return pl.pallas_call(
        _proj_kernel,
        out_shape=jax.ShapeDtypeStruct((M, Np, KDp), COMPUTE_DTYPE),
        grid=(M, Np // tile_m),
        in_specs=[pl.BlockSpec((tile_m, Fp), lambda m, i: (i, 0)),
                  pl.BlockSpec((1, Fp, KDp), lambda m, i: (m, 0, 0))],
        out_specs=pl.BlockSpec((1, tile_m, KDp), lambda m, i: (m, i, 0)),
        compiler_params=pltpu.CompilerParams(
            dimension_semantics=("parallel", "parallel")),
    )(h_pad, w_p)


# --------------------------------------------------------------------------
# Kernel 2: multi-head graph attention for one metapath, tiled over
# destination rows, with the SemanticAttention projection score fused in the
# epilogue (reduced to one scalar per (metapath, tile)).
# grid = (metapath m, dst tile i), both parallel.
# --------------------------------------------------------------------------
def _gat_attn_kernel(adj_ref, z_ref, al_ref, ar_ref, b_ref,
                     w1_ref, b1_ref, w2t_ref, zout_ref, s_ref,
                     *, num_heads, head_dim, tile_m, n_real):
    i = pl.program_id(1)
    adj = adj_ref[0]                                           # (TM, Np) int8
    edge = adj > 0

    z_all = z_ref[0]                                           # (Np, KDp) resident per metapath
    start = pl.multiple_of(i * tile_m, tile_m)
    z_dst = z_ref[0, pl.ds(start, tile_m), :]                  # dst rows = slice of resident z

    al = al_ref[0]                                             # (KDp, K) block-diag attn_l
    ar = ar_ref[0]                                             # (KDp, K) block-diag attn_r

    # per-head attention scores via MXU (block-diagonal AL / AR layouts)
    el_srcT = jnp.dot(z_all, al, preferred_element_type=jnp.float32).T   # (K, Np)
    er_dst = jnp.dot(z_dst, ar, preferred_element_type=jnp.float32)      # (TM, K)

    kdp = zout_ref.shape[-1]
    col = jax.lax.broadcasted_iota(jnp.int32, (1, kdp), 1)     # lane index

    out = jnp.zeros((tile_m, kdp), jnp.float32)
    for k in range(num_heads):                                 # static head loop
        # e[i, j] = leaky_relu(er[dst i] + el[src j]) on edges (src j -> dst i)
        e = er_dst[:, k:k + 1] + el_srcT[k:k + 1, :]           # (TM, Np)
        e = jnp.where(e > 0, e, 0.2 * e)                       # LeakyReLU(0.2)
        e = jnp.where(edge, e, -1e30)
        e = e - jnp.max(e, axis=1, keepdims=True)              # stable edge_softmax
        a = jnp.exp(e)                                         # masked entries underflow to 0
        denom = jnp.sum(a, axis=1, keepdims=True)
        alpha = a * pl.reciprocal(denom, approx=True)          # EUP reciprocal
        hk = jnp.dot(alpha.astype(z_all.dtype), z_all,
                     preferred_element_type=jnp.float32)       # (TM, KDp)
        # keep only head k's columns -> heads land concatenated, lane-dense
        hmask = (col >= k * head_dim) & (col < (k + 1) * head_dim)
        out = out + jnp.where(hmask, hk, 0.0)

    out = _elu(out + b_ref[0])                                 # bias + ELU
    zout_ref[0] = out.astype(zout_ref.dtype)                   # lane-dense store

    # Fused SemanticAttention score:  sum_{real rows in tile} tanh(z W1 + b1) W2
    rows = jax.lax.broadcasted_iota(jnp.int32, (tile_m, 1), 0) + start
    valid = rows < n_real                                      # mask padded dst rows
    p = jnp.tanh(jnp.dot(out.astype(w1_ref.dtype), w1_ref[...],
                         preferred_element_type=jnp.float32) + b1_ref[...])  # (TM, H)
    p = jnp.where(valid, p, 0.0)
    p_sum = jnp.sum(p, axis=0, keepdims=True)                  # (1, H) sublane reduce
    s_tile = jnp.sum(p_sum * w2t_ref[...], axis=1, keepdims=True)   # (1, 1) VPU dot
    s_ref[0, 0] = s_tile * jnp.ones((8, LANE), jnp.float32)    # lane-dense scalar slab


def gat_attention(adj_i8, z_proj, al_p, ar_p, b_p, w1_p, b1, w2t,
                  *, num_heads, head_dim, tile_m, n_real):
    M, Np, KDp = z_proj.shape
    H = w1_p.shape[1]
    T = Np // tile_m
    kernel = functools.partial(_gat_attn_kernel, num_heads=num_heads,
                               head_dim=head_dim, tile_m=tile_m, n_real=n_real)
    return pl.pallas_call(
        kernel,
        out_shape=(jax.ShapeDtypeStruct((M, Np, KDp), COMPUTE_DTYPE),
                   jax.ShapeDtypeStruct((M, T, 8, LANE), jnp.float32)),
        grid=(M, T),
        in_specs=[
            pl.BlockSpec((1, tile_m, Np), lambda m, i: (m, i, 0)),        # int8 adj tile
            pl.BlockSpec((1, Np, KDp), lambda m, i: (m, 0, 0)),           # precomputed z
            pl.BlockSpec((1, KDp, num_heads), lambda m, i: (m, 0, 0)),    # attn_l (block-diag)
            pl.BlockSpec((1, KDp, num_heads), lambda m, i: (m, 0, 0)),    # attn_r (block-diag)
            pl.BlockSpec((1, 1, KDp), lambda m, i: (m, 0, 0)),            # GAT bias
            pl.BlockSpec((KDp, H), lambda m, i: (0, 0)),                  # semantic W1
            pl.BlockSpec((1, H), lambda m, i: (0, 0)),                    # semantic b1
            pl.BlockSpec((1, H), lambda m, i: (0, 0)),                    # semantic W2^T
        ],
        out_specs=[
            pl.BlockSpec((1, tile_m, KDp), lambda m, i: (m, i, 0)),
            pl.BlockSpec((1, 1, 8, LANE), lambda m, i: (m, i, 0, 0)),
        ],
        compiler_params=pltpu.CompilerParams(
            dimension_semantics=("parallel", "parallel"),
            vmem_limit_bytes=VMEM_LIMIT),
    )(adj_i8, z_proj, al_p, ar_p, b_p, w1_p, b1, w2t)


# --------------------------------------------------------------------------
# Kernel 3: beta-weighted combination of metapath embeddings (intermediate
# layers), tiled over rows.
# --------------------------------------------------------------------------
def _combine_kernel(z_ref, beta_ref, out_ref):
    out_ref[...] = jnp.sum(z_ref[...].astype(jnp.float32) * beta_ref[...],
                           axis=0).astype(out_ref.dtype)


def semantic_combine(z, beta, tile_n):
    M, Np, KDp = z.shape
    return pl.pallas_call(
        _combine_kernel,
        out_shape=jax.ShapeDtypeStruct((Np, KDp), COMPUTE_DTYPE),
        grid=(Np // tile_n,),
        in_specs=[pl.BlockSpec((M, tile_n, KDp), lambda i: (0, i, 0)),
                  pl.BlockSpec((M, 1, 1), lambda i: (0, 0, 0))],
        out_specs=pl.BlockSpec((tile_n, KDp), lambda i: (i, 0)),
        compiler_params=pltpu.CompilerParams(dimension_semantics=("parallel",)),
    )(z, beta)


# --------------------------------------------------------------------------
# Kernel 4 (last layer): fused combine + prediction Linear, tiled over rows.
# out = (sum_m beta_m z_m) @ W + b
# --------------------------------------------------------------------------
def _combine_predict_kernel(z_ref, beta_ref, w_ref, b_ref, out_ref):
    x = jnp.sum(z_ref[...].astype(jnp.float32) * beta_ref[...], axis=0)
    out_ref[...] = (jnp.dot(x.astype(w_ref.dtype), w_ref[...],
                            preferred_element_type=jnp.float32) + b_ref[...])


def semantic_combine_predict(z, beta, w, b, tile_n):
    M, Np, KDp = z.shape
    Op = w.shape[1]
    return pl.pallas_call(
        _combine_predict_kernel,
        out_shape=jax.ShapeDtypeStruct((Np, Op), jnp.float32),
        grid=(Np // tile_n,),
        in_specs=[pl.BlockSpec((M, tile_n, KDp), lambda i: (0, i, 0)),
                  pl.BlockSpec((M, 1, 1), lambda i: (0, 0, 0)),
                  pl.BlockSpec((KDp, Op), lambda i: (0, 0)),
                  pl.BlockSpec((1, Op), lambda i: (0, 0))],
        out_specs=pl.BlockSpec((tile_n, Op), lambda i: (i, 0)),
        compiler_params=pltpu.CompilerParams(dimension_semantics=("parallel",)),
    )(z, beta, w, b)


# --------------------------------------------------------------------------
# HAN forward (padding + glue in plain JAX; heavy lifting in the kernels).
# --------------------------------------------------------------------------
def han_forward(adj, h, layer_params, predict_params):
    """adj: (M, N, N) 0/1 mask per metapath (must include self-loops so no
    destination row is isolated, matching DGL's metapath graphs).
    h: (N, in_size). Returns (N, out_size)."""
    M, N, _ = adj.shape
    Np0 = _round_up(N, LANE)
    tile_m = min(TILE_M, Np0)
    Np = _round_up(N, tile_m)
    tile_n = COMBINE_TILE if Np % COMBINE_TILE == 0 else tile_m

    # int8 adjacency, zero-padded to (M, Np, Np)
    adj_i8 = jnp.zeros((M, Np, Np), jnp.int8).at[:, :N, :N].set(adj.astype(jnp.int8))

    in_logical = h.shape[1]
    in_p = _round_up(in_logical, LANE)
    h_pad = jnp.zeros((Np, in_p), COMPUTE_DTYPE).at[:N, :in_logical].set(
        h.astype(COMPUTE_DTYPE))

    n_layers = len(layer_params)
    for li, (gat_p, sem_p) in enumerate(layer_params):
        K, D = gat_p["al"].shape[1], gat_p["al"].shape[2]
        KD = K * D
        KDp = _round_up(KD, LANE)

        # pad & pre-cast fc weight / bias; block-diagonal attn_l / attn_r layouts
        w_p = jnp.zeros((M, in_p, KDp), COMPUTE_DTYPE).at[:, :in_logical, :KD].set(
            gat_p["w"].astype(COMPUTE_DTYPE))
        al_p = jnp.zeros((M, KDp, K), COMPUTE_DTYPE)
        ar_p = jnp.zeros((M, KDp, K), COMPUTE_DTYPE)
        for k in range(K):
            al_p = al_p.at[:, k * D:(k + 1) * D, k].set(
                gat_p["al"][:, k, :].astype(COMPUTE_DTYPE))
            ar_p = ar_p.at[:, k * D:(k + 1) * D, k].set(
                gat_p["ar"][:, k, :].astype(COMPUTE_DTYPE))
        b_p = jnp.zeros((M, 1, KDp), jnp.float32).at[:, :, :KD].set(gat_p["b"])
        H = sem_p["w1"].shape[1]
        w1_p = jnp.zeros((KDp, H), COMPUTE_DTYPE).at[:KD, :].set(
            sem_p["w1"].astype(COMPUTE_DTYPE))
        b1 = sem_p["b1"].astype(jnp.float32)
        w2t = sem_p["w2"].T.astype(jnp.float32)                    # (1, H)

        # 1) hoisted per-metapath projection; 2) attention + fused semantic score
        z_proj = project(h_pad, w_p, tile_m=tile_m)                # (M, Np, KDp)
        z_emb, s_part = gat_attention(adj_i8, z_proj, al_p, ar_p, b_p,
                                      w1_p, b1, w2t,
                                      num_heads=K, head_dim=D,
                                      tile_m=tile_m, n_real=N)

        # SemanticAttention: mean over real nodes, softmax over metapaths (tiny)
        scores = jnp.sum(s_part[:, :, 0, 0], axis=1) / N           # (M,)
        beta = jax.nn.softmax(scores).reshape(M, 1, 1).astype(jnp.float32)

        if li == n_layers - 1:
            out_size = predict_params["w"].shape[1]
            Op = _round_up(out_size, LANE)
            wpr = jnp.zeros((KDp, Op), COMPUTE_DTYPE).at[:KD, :out_size].set(
                predict_params["w"].astype(COMPUTE_DTYPE))
            bpr = jnp.zeros((1, Op), jnp.float32).at[:, :out_size].set(
                predict_params["b"])
            out = semantic_combine_predict(z_emb, beta, wpr, bpr, tile_n)
            return out[:N, :out_size]

        h_pad = semantic_combine(z_emb, beta, tile_n)              # (Np, KDp)
        in_logical, in_p = KD, KDp


# --------------------------------------------------------------------------
# Deterministic parameter init (logical shapes follow HAN.__init__).
# --------------------------------------------------------------------------
def init_params(key, num_meta, in_size, hidden, out_size, num_heads):
    layers = []
    cur_in = in_size
    for K in num_heads:
        key, kw, kal, kar, kw1, kw2 = jax.random.split(key, 6)
        KD = hidden * K
        gat = dict(
            w=0.1 * jax.random.normal(kw, (num_meta, cur_in, KD), jnp.float32),
            al=0.1 * jax.random.normal(kal, (num_meta, K, hidden), jnp.float32),
            ar=0.1 * jax.random.normal(kar, (num_meta, K, hidden), jnp.float32),
            b=jnp.zeros((num_meta, 1, KD), jnp.float32),
        )
        sem = dict(
            w1=0.1 * jax.random.normal(kw1, (KD, SEM_HIDDEN), jnp.float32),
            b1=jnp.zeros((1, SEM_HIDDEN), jnp.float32),
            w2=0.1 * jax.random.normal(kw2, (SEM_HIDDEN, 1), jnp.float32),
        )
        layers.append((gat, sem))
        cur_in = KD
    key, kp = jax.random.split(key)
    predict = dict(
        w=0.1 * jax.random.normal(kp, (cur_in, out_size), jnp.float32),
        b=jnp.zeros((1, out_size), jnp.float32),
    )
    return layers, predict


# --------------------------------------------------------------------------
# Pure-JAX f32 reference (same math) for a correctness check.
# --------------------------------------------------------------------------
def _ref_gat(adj, h, w, al, ar, b):
    z = h @ w
    K, D = al.shape
    outs = []
    for k in range(K):
        zk = z[:, k * D:(k + 1) * D]
        el = (zk * al[k]).sum(-1)
        er = (zk * ar[k]).sum(-1)
        e = er[:, None] + el[None, :]
        e = jnp.where(e > 0, e, 0.2 * e)
        e = jnp.where(adj > 0, e, -1e30)
        e = e - e.max(axis=1, keepdims=True)
        a = jnp.exp(e) * adj
        alpha = a / jnp.maximum(a.sum(1, keepdims=True), 1e-9)
        outs.append(alpha @ zk)
    out = jnp.concatenate(outs, -1) + b
    return _elu(out)


def _ref_forward(adj, h, layers, predict):
    M = adj.shape[0]
    for gat_p, sem_p in layers:
        zs = jnp.stack(
            [_ref_gat(adj[m], h, gat_p["w"][m], gat_p["al"][m],
                      gat_p["ar"][m], gat_p["b"][m]) for m in range(M)], 0)
        scores = []
        for m in range(M):
            p = jnp.tanh(zs[m] @ sem_p["w1"] + sem_p["b1"])
            scores.append(jnp.mean(p @ sem_p["w2"]))
        beta = jax.nn.softmax(jnp.stack(scores))
        h = jnp.einsum("m,mnd->nd", beta, zs)
    return h @ predict["w"] + predict["b"]


if __name__ == "__main__":
    # Small, module-consistent shapes (N padded to 256).
    N = 200                # nodes
    M = 2                  # meta-paths
    in_size = 8
    hidden = 8
    out_size = 4
    num_heads = [2, 2]     # two HANLayers
    # dropout is unused at inference (eval mode no-op)

    key = jax.random.PRNGKey(0)
    k_adj, k_h, k_p = jax.random.split(key, 3)

    # Dense metapath-reachable adjacency masks with self-loops
    # (no destination has zero in-degree, matching DGL metapath graphs).
    adj = (jax.random.uniform(k_adj, (M, N, N)) < 0.3).astype(jnp.float32)
    adj = jnp.maximum(adj, jnp.eye(N, dtype=jnp.float32)[None])
    h = jax.random.normal(k_h, (N, in_size), jnp.float32)

    layers, predict = init_params(k_p, M, in_size, hidden, out_size, num_heads)

    out = han_forward(adj, h, layers, predict)
    out = jax.block_until_ready(out)
    assert out.shape == (N, out_size), out.shape

    with jax.default_matmul_precision("highest"):
        ref = _ref_forward(adj, h, layers, predict)
    err = float(jnp.abs(out - ref).max())
    assert jnp.allclose(out, ref, rtol=3e-2, atol=3e-2), err

    print("KERNEL_OK")
</pallas_src>

<mosaic_0001>
module attributes {stable_mosaic.version = 11 : i64} {
  func.func @_proj_kernel(%arg0: i32, %arg1: i32, %arg2: memref<256x128xf32, #tpu.memory_space<vmem>>, %arg3: memref<1x128x128xf32, #tpu.memory_space<vmem>>, %arg4: memref<1x256x128xf32, #tpu.memory_space<vmem>>) attributes {dimension_semantics = [#tpu.dimension_semantics<parallel>, #tpu.dimension_semantics<parallel>], iteration_bounds = array<i64: 2, 1>, scalar_prefetch = 0 : i64, scratch_operands = 0 : i64, tpu.core_type = #tpu.core_type<tc>, window_params = [{transform_indices = @transform_0, window_bounds = array<i64: 256, 128>}, {transform_indices = @transform_1, window_bounds = array<i64: 1, 128, 128>}, {transform_indices = @transform_2, window_bounds = array<i64: 1, 256, 128>}]} {
    %c0 = arith.constant 0 : index
    %c0_0 = arith.constant 0 : index
    %0 = vector.load %arg2[%c0, %c0_0] : memref<256x128xf32, #tpu.memory_space<vmem>>, vector<256x128xf32>
    %c0_1 = arith.constant 0 : index
    %c0_2 = arith.constant 0 : index
    %c0_3 = arith.constant 0 : index
    %1 = vector.load %arg3[%c0_1, %c0_2, %c0_3] : memref<1x128x128xf32, #tpu.memory_space<vmem>>, vector<1x128x128xf32>
    %2 = vector.shape_cast %1 : vector<1x128x128xf32> to vector<128x128xf32>
    %cst = arith.constant dense<0.000000e+00> : vector<256x128xf32>
    %3 = tpu.matmul %0, %2, %cst {dimension_numbers = #tpu.dot_dimension_numbers<[1], [0], [0], [1], [0, 0, 1, 1], [], []>} : vector<256x128xf32>, vector<128x128xf32>, vector<256x128xf32> -> vector<256x128xf32>
    %c0_4 = arith.constant 0 : index
    %c0_5 = arith.constant 0 : index
    %c0_6 = arith.constant 0 : index
    %4 = vector.load %arg4[%c0_4, %c0_5, %c0_6] : memref<1x256x128xf32, #tpu.memory_space<vmem>>, vector<1x256x128xf32>
    %5 = vector.shape_cast %4 : vector<1x256x128xf32> to vector<256x128xf32>
    %6 = vector.shape_cast %3 : vector<256x128xf32> to vector<1x256x128xf32>
    tpu.vector_store %arg4[%c0_4, %c0_5, %c0_6], %6 {strides = array<i32>} : memref<1x256x128xf32, #tpu.memory_space<vmem>>, vector<1x256x128xf32>,
    return
  }
  func.func @transform_0(%arg0: i32, %arg1: i32) -> (i32, i32) {
    %c0_i32 = arith.constant 0 : i32
    %c0_i32_0 = arith.constant 0 : i32
    return %arg1, %c0_i32 : i32, i32
  }
  func.func @transform_1(%arg0: i32, %arg1: i32) -> (i32, i32, i32) {
    %c0_i32 = arith.constant 0 : i32
    %c0_i32_0 = arith.constant 0 : i32
    %c0_i32_1 = arith.constant 0 : i32
    return %arg0, %c0_i32, %c0_i32_0 : i32, i32, i32
  }
  func.func @transform_2(%arg0: i32, %arg1: i32) -> (i32, i32, i32) {
    %c0_i32 = arith.constant 0 : i32
    %c0_i32_0 = arith.constant 0 : i32
    return %arg0, %arg1, %c0_i32 : i32, i32, i32
  }
}

</mosaic_0001>

<bundles_post_ra>
// kernel: tpu_custom_call.1
= control target key start
LH: loop header
LB: loop body
LE: loop exit
PB: predicated region body
PF: predicated region fallthrough
CT: control target
= control target key end

     0   :  { %7 = vsyncpa [#allocation3], 0  ;;  %s1279_s0 = inlined_call_operand.hbm [shape: f32[256,128], index: 0, kind: input, shape index: {}]   ;;  %s1280_s1 = inlined_call_operand.hbm [shape: f32[2,128,128], index: 1, kind: input, shape index: {}]   ;;  %s1281_s2 = inlined_call_operand.hbm [shape: f32[2,256,128], index: 2, kind: output, shape index: {}]  }
   0x1   :  { %8 = vsyncpa [#allocation6], 0 }
   0x2   :  { %10 = vsyncpa [#allocation6 + $0x1], 0 }
   0x3   :  { %11 = vsyncpa [#allocation4], 0 }
   0x4   :  { %13 = vsyncpa [#allocation4 + $0x1], 0  ;;  %s1038_s9 = smov 0   ;;  %s1040_s10 = smov 0  }
   0x5   :  { %s1042_s11 = smov 0   ;;  %s1044_s12 = smov 0  }
   0x6   :  { %s1046_s13 = smov 0   ;;  %s1048_s14 = smov 0  }
   0x7 LB: > { %s620_s15 = sadd.s32 4294967295, %s1014_s14   ;;  %s621_s16 = sadd.s32 4294967294, %s1014_s14   ;;  %s1014_s14 = sphi %s1048_s14, %s19_s14   ;;  %s1010_s13 = sphi %s1046_s13, %s1301_s13   ;;  %s1006_s12 = sphi %s1044_s12, %s1300_s12   ;;  %s1002_s11 = sphi %s1042_s11, %s1299_s11   ;;  %s998_s10 = sphi %s1040_s10, %s1298_s10   ;;  %s994_s9 = sphi %s1038_s9, %s1297_s9  }
   0x8   : > { %p77_p0 = scmp.ne.s32.totalorder %s998_s10, %s994_s9  ;;  %p1072_p1 = scmp.eq.s32.totalorder %s620_s15, 0 }
   0x9   : > { %p1076_p2 = scmp.eq.s32.totalorder %s620_s15, 1  ;;  %p109_p3 = scmp.eq.s32.totalorder %s621_s16, 1 }
   0xa   : > { %p1082_p4 = por %p1072_p1, %p77_p0  ;;  %p622_p5 = scmp.ge.s32.totalorder %s1014_s14, 1 }
   0xb   : > { %p1087_p6 = por %p109_p3, %p77_p0  ;;  %p116_p7 = scmp.lt.s32.totalorder %s1014_s14, 3 }
   0xc   : > { %s1286_s19 = scalar_select %p1082_p4, 1, 0 }
   0xd   : > { %s1287_s20 = scalar_select %p1087_p6, 1, 0 }
   0xe   : > { %p1092_p8 = pnand %p622_p5, %p116_p7  ;;  %s1016_s22 = smov [#allocation2]  }
   0xf   : > { %s131_s23 = sshll.u32 %s1016_s22, 4  ;;  %s31_s25 = sadd.s32 1, %s1010_s13  ;;  %s132_s23 = int_to_ptr.vmem [resolvable:$true] %s131_s23 }
  0x10   : > { %p807_p9 = pneg %p1092_p8  ;;  %s887_s26 = scalar_lea.vmem %s132_s23, 4096 }
  0x11   : > { %p888_p13 = scmp.ne.s32.totalorder %s132_s23, %s887_s26  ;;  %p895_p5 = scmp.lt.s32.totalorder %s132_s23, %s132_s23 }
  0x12   : > { %p1101_p11 = pnand %p807_p9, %p1072_p1  ;;  %p896_p7 = scmp.lt.s32.totalorder %s887_s26, %s887_s26 }
  0x14   : > { %p878_p12 = pneg %p1101_p11  ;;  %p897_p6 = por %p896_p7, %p895_p5 }
  0x16   : > { %p890_p0 = pnand %p888_p13, %p878_p12 }
  0x18   : > { %p891_p3 = pneg %p890_p0 }
  0x1a   : > { %p898_p4 = pnand %p897_p6, %p891_p3 }
  0x1c   : > { %901 = shalt.err (!%p898_p4)
}
  0x1d   : > { %s1283_s27 = smov 128   ;;  %s1018_s28 = smov 8  }
  0x1e   : > { %810 = dma.hbm_to_vmem [thread:$0]  (!%p1101_p11), %s1279_s0, 4096, %s132_s23, [#allocation3], %s1283_s27, %s1283_s27, %s1018_s28  }
  0x1f   : > { %p33_p4 = scmp.ge.s32.totalorder %s31_s25, 2  ;;  %s64_s3 = sadd.s32 1, %s1002_s11 }
  0x20   : > { %p71_p6 = scmp.ne.s32.totalorder %s1002_s11, %s998_s10  ;;  %p72_p9 = scmp.eq.s32.totalorder %s1014_s14, 0 }
  0x21   : > { %s1303_s25 = smov (%p33_p4, %s31_s25), 0  ;;  %p820_p0 = scmp.lt.s32.totalorder %s1014_s14, 2 }
  0x22   : > { %p1122_p12 = por %p72_p9, %p71_p6  ;;  %p1128_p13 = por %p1076_p2, %p71_p6 }
  0x23   : > { %s61_s6 = ssub.s32 %s1010_s13, %s1303_s25  ;;  %s145_s7 = sand.u32 1, %s1002_s11  }
  0x24   : > { %p62_p11 = scmp.eq.s32.totalorder %s61_s6, 0  ;;  %s625_s8 = sshll.u32 %s145_s7, 7 }
  0x25   : > { %s637_s16 = sshll.u32 %s1010_s13, 11  ;;  %s149_s26 = scalar_lea.vmem [#allocation5], %s625_s8 }
  0x26   : > { %s1137_s15 = scalar_select %p62_p11, %s1002_s11, %s64_s3  }
  0x27   : > { %s155_s24 = scalar_lea.hbm %s1280_s1, %s637_s16  ;;  %s156_s29 = sshll.u32 %s149_s26, 4  ;;  %s157_s29 = int_to_ptr.vmem [resolvable:$true] %s156_s29 }
  0x28   : > { %p1145_p2 = pnand %p820_p0, %p1122_p12  ;;  %s146_s30 = scalar_lea.sflag [#allocation6], %s145_s7 }
  0x29   : > { %s915_s6 = scalar_lea.vmem %s157_s29, 2048  ;;  %s1019_s3 = smov [#allocation5]  }
  0x2a   : > { %p904_p3 = pneg %p1145_p2  ;;  %p916_p5 = scmp.ne.s32.totalorder %s157_s29, %s915_s6 }
  0x2b   : > { %s920_s27 = sshll.u32 %s1019_s3, 4  ;;  %s921_s27 = int_to_ptr.vmem [resolvable:$false] %s920_s27 }
  0x2c   : > { %p918_p7 = pnand %p916_p5, %p904_p3  ;;  %s922_s16 = scalar_lea.vmem %s921_s27, 4096 }
  0x2d   : > { %p923_p6 = scmp.lt.s32.totalorder %s157_s29, %s921_s27  ;;  %p924_p9 = scmp.lt.s32.totalorder %s922_s16, %s915_s6 }
  0x2e   : > { %p919_p4 = pneg %p918_p7 }
  0x2f   : > { %p925_p11 = por %p924_p9, %p923_p6 }
  0x31   : > { %p926_p10 = pnand %p925_p11, %p919_p4 }
  0x33   : > { %929 = shalt.err (!%p926_p10)
}
  0x34   : > { %s1293_s4 = smov 128   ;;  %168 = sbr.rel (%p1092_p8) target bundleno = 333 (0x14d), region = 28 }
  0x35   : > { %814 = dma.hbm_to_vmem [thread:$0]  (!%p1145_p2), %s155_s24, 2048, %s157_s29, %s146_s30, %s1293_s4, %s1293_s4, %s1018_s28  }
  0x39   : > { %981 = dma.done.wait (%p1072_p1), [#allocation3], 4096  }
  0x3a   : > { %983 = vsyncadd (%p1072_p1), [#allocation3], 4294963200  ;;  %s1163_s27 = sand.u32 1, %s998_s10   ;;  %p1294_p10 = scmp.ne.s32.totalorder %s1286_s19, 0 }
  0x3b   : > { %s630_s7 = sshll.u32 %s1163_s27, 7  ;;  %s175_s8 = scalar_lea.sflag [#allocation6], %s1163_s27 }
  0x3c   : > { %s1167_s22 = scalar_lea.vmem [#allocation5], %s630_s7 }
  0x3d   : > { %985 = dma.done.wait (%p1294_p10), %s175_s8, 2048  }
  0x3e   : > { %987 = vsyncadd (%p1294_p10), %s175_s8, 4294965248  ;;  %v248_v0 = vld [vmem:[%s1167_s22 + $0x78] sm:$0xff]  ;;  %v247_v1 = vld [vmem:[%s1167_s22 + $0x70] sm:$0xff]  ;;  %s631_s17 = sshll.u32 %s1163_s27, 8  ;;  %s638_s21 = sshll.u32 %s1006_s12, 12 }
  0x3f   : > { %687 = vmatprep.subr.mxu0 %v248_v0  ;;  %767 = vmatprep.subr.mxu1 %v248_v0  ;;  %v246_v2 = vld [vmem:[%s1167_s22 + $0x68] sm:$0xff]  ;;  %v245_v3 = vld [vmem:[%s1167_s22 + $0x60] sm:$0xff]  ;;  %v244_v4 = vld [vmem:[%s1167_s22 + $0x58] sm:$0xff]  ;;  %s1190_s19 = scalar_lea.vmem [#allocation7], %s631_s17  ;;  %s1225_s26 = scalar_lea.hbm %s1281_s2, %s638_s21 }
  0x40   : > { %688 = vmatpush3.msra.mxu0 %v248_v0  ;;  %783 = vmatpush3.msra.mxu1 %v248_v0  ;;  %v243_v5 = vld [vmem:[%s1167_s22 + $0x50] sm:$0xff]  ;;  %v242_v6 = vld [vmem:[%s1167_s22 + $0x48] sm:$0xff]  ;;  %v241_v7 = vld [vmem:[%s1167_s22 + $0x40] sm:$0xff]  ;;  %s522_s28 = sshll.u32 %s1190_s19, 4  ;;  %s507_s12 = scalar_lea.sflag [#allocation4], %s1163_s27  ;;  %s1227_s28 = int_to_ptr.vmem [resolvable:$true] %s522_s28 }
  0x41   : > { %689 = vmatprep.subr.mxu0 %v247_v1  ;;  %768 = vmatprep.subr.mxu1 %v247_v1  ;;  %v240_v8 = vld [vmem:[%s1167_s22 + $0x38] sm:$0xff]  ;;  %v239_v9 = vld [vmem:[%s1167_s22 + $0x30] sm:$0xff]  ;;  %v238_v10 = vld [vmem:[%s1167_s22 + $0x28] sm:$0xff]  ;;  %s930_s29 = scalar_lea.vmem %s1227_s28, 4096  ;;  %s1020_s18 = smov [#allocation7]  }
  0x42   : > { %690 = vmatpush3.msra.mxu0 %v247_v1  ;;  %784 = vmatpush3.msra.mxu1 %v247_v1  ;;  %v237_v11 = vld [vmem:[%s1167_s22 + $0x20] sm:$0xff]  ;;  %v236_v12 = vld [vmem:[%s1167_s22 + $0x18] sm:$0xff]  ;;  %v235_v13 = vld [vmem:[%s1167_s22 + $0x10] sm:$0xff]  ;;  %p931_p1 = scmp.ne.s32.totalorder %s1227_s28, %s930_s29  ;;  %s934_s30 = sshll.u32 %s1020_s18, 4  ;;  %s935_s30 = int_to_ptr.vmem [resolvable:$false] %s934_s30 }
  0x43   : > { %691 = vmatprep.subr.mxu0 %v246_v2  ;;  %769 = vmatprep.subr.mxu1 %v246_v2  ;;  %v234_v14 = vld [vmem:[%s1167_s22 + $0x8] sm:$0xff]  ;;  %v233_v15 = vld [vmem:[%s1167_s22] sm:$0xff]  ;;  %v203_v20 = vld [vmem:[#allocation2 + $0x10] sm:$0xff]  ;;  %s936_s6 = scalar_lea.vmem %s935_s30, 8192  ;;  %p937_p0 = scmp.lt.s32.totalorder %s1227_s28, %s935_s30 }
  0x44   : > { %692 = vmatpush3.msra.mxu0 %v246_v2  ;;  %785 = vmatpush3.msra.mxu1 %v246_v2  ;;  %v201_v16 = vld [vmem:[#allocation2] sm:$0xff]  ;;  %v202_v18 = vld [vmem:[#allocation2 + $0x8] sm:$0xff]  ;;  %v219_v21 = vld [vmem:[#allocation2 + $0x90] sm:$0xff]  ;;  %p932_p8 = pnand %p931_p1, %p1128_p13  ;;  %p938_p2 = scmp.lt.s32.totalorder %s936_s6, %s930_s29 }
  0x45   : > { %693 = vmatprep.subr.mxu0 %v245_v3  ;;  %770 = vmatprep.subr.mxu1 %v245_v3  ;;  %v217_v17 = vld [vmem:[#allocation2 + $0x80] sm:$0xff]  ;;  %v218_v19 = vld [vmem:[#allocation2 + $0x88] sm:$0xff]  ;;  %v204_v22 = vld [vmem:[#allocation2 + $0x18] sm:$0xff] }
  0x46   : > { %694 = vmatpush3.msra.mxu0 %v245_v3  ;;  %786 = vmatpush3.msra.mxu1 %v245_v3  ;;  %v220_v23 = vld [vmem:[#allocation2 + $0x98] sm:$0xff]  ;;  %v205_v24 = vld [vmem:[#allocation2 + $0x20] sm:$0xff]  ;;  %v206_v26 = vld [vmem:[#allocation2 + $0x28] sm:$0xff]  ;;  %p933_p12 = pneg %p932_p8  ;;  %p939_p3 = por %p938_p2, %p937_p0 }
  0x47   : > { %695 = vmatprep.subr.mxu0 %v244_v4  ;;  %771 = vmatprep.subr.mxu1 %v244_v4  ;;  %v221_v25 = vld [vmem:[#allocation2 + $0xa0] sm:$0xff]  ;;  %v222_v27 = vld [vmem:[#allocation2 + $0xa8] sm:$0xff]  ;;  %v207_v28 = vld [vmem:[#allocation2 + $0x30] sm:$0xff] }
  0x48   : > { %696 = vmatpush3.msra.mxu0 %v244_v4  ;;  %787 = vmatpush3.msra.mxu1 %v244_v4  ;;  %v223_v29 = vld [vmem:[#allocation2 + $0xb0] sm:$0xff]  ;;  %v208_v30 = vld [vmem:[#allocation2 + $0x38] sm:$0xff]  ;;  %v209_v32 = vld [vmem:[#allocation2 + $0x40] sm:$0xff]  ;;  %p940_p5 = pnand %p939_p3, %p933_p12 }
  0x49   : > { %697 = vmatprep.subr.mxu0 %v243_v5  ;;  %772 = vmatprep.subr.mxu1 %v243_v5  ;;  %v224_v31 = vld [vmem:[#allocation2 + $0xb8] sm:$0xff]  ;;  %v225_v33 = vld [vmem:[#allocation2 + $0xc0] sm:$0xff]  ;;  %v210_v34 = vld [vmem:[#allocation2 + $0x48] sm:$0xff] }
  0x4a   : > { %698 = vmatpush3.msra.mxu0 %v243_v5  ;;  %788 = vmatpush3.msra.mxu1 %v243_v5  ;;  %v226_v35 = vld [vmem:[#allocation2 + $0xc8] sm:$0xff]  ;;  %v211_v36 = vld [vmem:[#allocation2 + $0x50] sm:$0xff]  ;;  %v212_v38 = vld [vmem:[#allocation2 + $0x58] sm:$0xff] }
  0x4b   : > { %699 = vmatprep.subr.mxu0 %v242_v6  ;;  %773 = vmatprep.subr.mxu1 %v242_v6  ;;  %v227_v37 = vld [vmem:[#allocation2 + $0xd0] sm:$0xff]  ;;  %v228_v39 = vld [vmem:[#allocation2 + $0xd8] sm:$0xff]  ;;  %v213_v40 = vld [vmem:[#allocation2 + $0x60] sm:$0xff] }
  0x4c   : > { %700 = vmatpush3.msra.mxu0 %v242_v6  ;;  %789 = vmatpush3.msra.mxu1 %v242_v6  ;;  %v229_v41 = vld [vmem:[#allocation2 + $0xe0] sm:$0xff]  ;;  %v214_v42 = vld [vmem:[#allocation2 + $0x68] sm:$0xff]  ;;  %v215_v44 = vld [vmem:[#allocation2 + $0x70] sm:$0xff] }
  0x4d   : > { %701 = vmatprep.subr.mxu0 %v241_v7  ;;  %774 = vmatprep.subr.mxu1 %v241_v7  ;;  %v230_v43 = vld [vmem:[#allocation2 + $0xe8] sm:$0xff]  ;;  %v231_v45 = vld [vmem:[#allocation2 + $0xf0] sm:$0xff]  ;;  %v216_v46 = vld [vmem:[#allocation2 + $0x78] sm:$0xff] }
  0x4e   : > { %702 = vmatpush3.msra.mxu0 %v241_v7  ;;  %790 = vmatpush3.msra.mxu1 %v241_v7  ;;  %v232_v47 = vld [vmem:[#allocation2 + $0xf8] sm:$0xff] }
  0x4f   : > { %703 = vmatprep.subr.mxu0 %v240_v8  ;;  %775 = vmatprep.subr.mxu1 %v240_v8 }
  0x50   : > { %704 = vmatpush3.msra.mxu0 %v240_v8  ;;  %791 = vmatpush3.msra.mxu1 %v240_v8 }
  0x51   : > { %705 = vmatprep.subr.mxu0 %v239_v9  ;;  %776 = vmatprep.subr.mxu1 %v239_v9 }
  0x52   : > { %706 = vmatpush3.msra.mxu0 %v239_v9  ;;  %792 = vmatpush3.msra.mxu1 %v239_v9 }
  0x53   : > { %707 = vmatprep.subr.mxu0 %v238_v10  ;;  %777 = vmatprep.subr.mxu1 %v238_v10 }
  0x54   : > { %708 = vmatpush3.msra.mxu0 %v238_v10  ;;  %793 = vmatpush3.msra.mxu1 %v238_v10 }
  0x55   : > { %709 = vmatprep.subr.mxu0 %v237_v11  ;;  %778 = vmatprep.subr.mxu1 %v237_v11 }
  0x56   : > { %710 = vmatpush3.msra.mxu0 %v237_v11  ;;  %794 = vmatpush3.msra.mxu1 %v237_v11 }
  0x57   : > { %711 = vmatprep.subr.mxu0 %v236_v12  ;;  %779 = vmatprep.subr.mxu1 %v236_v12 }
  0x58   : > { %712 = vmatpush3.msra.mxu0 %v236_v12  ;;  %795 = vmatpush3.msra.mxu1 %v236_v12 }
  0x59   : > { %713 = vmatprep.subr.mxu0 %v235_v13  ;;  %780 = vmatprep.subr.mxu1 %v235_v13 }
  0x5a   : > { %714 = vmatpush3.msra.mxu0 %v235_v13  ;;  %796 = vmatpush3.msra.mxu1 %v235_v13 }
  0x5b   : > { %715 = vmatprep.subr.mxu0 %v234_v14  ;;  %781 = vmatprep.subr.mxu1 %v234_v14 }
  0x5c   : > { %716 = vmatpush3.msra.mxu0 %v234_v14  ;;  %797 = vmatpush3.msra.mxu1 %v234_v14 }
  0x5d   : > { %717 = vmatprep.subr.mxu0 %v233_v15  ;;  %782 = vmatprep.subr.mxu1 %v233_v15 }
  0x5e   : > { %718 = vmatpush3.msra.mxu0 %v233_v15  ;;  %798 = vmatpush3.msra.mxu1 %v233_v15 }
  0x5f   : > { %719 = vmatprep.mubr.f32.mxu0 %v201_v16  ;;  %743 = vmatprep.mubr.f32.mxu1 %v217_v17 }
  0x60   : > { %720 = vmatmul.mubr.f32.vlgmr.msra.gmra.mxu0 %v202_v18  ;;  %744 = vmatmul.mubr.f32.vlgmr.msra.gmra.mxu1 %v218_v19 }
  0x61   : > { %722 = vmatprep.mubr.f32.mxu0 %v203_v20  ;;  %746 = vmatprep.mubr.f32.mxu1 %v219_v21 }
  0x64   : > { %723 = vmatmul.mubr.f32.gmra.mxu0 %v204_v22  ;;  %747 = vmatmul.mubr.f32.gmra.mxu1 %v220_v23 }
  0x65   : > { %725 = vmatprep.mubr.f32.mxu0 %v205_v24  ;;  %749 = vmatprep.mubr.f32.mxu1 %v221_v25 }
  0x68   : > { %726 = vmatmul.mubr.f32.gmra.mxu0 %v206_v26  ;;  %750 = vmatmul.mubr.f32.gmra.mxu1 %v222_v27 }
  0x69   : > { %728 = vmatprep.mubr.f32.mxu0 %v207_v28  ;;  %752 = vmatprep.mubr.f32.mxu1 %v223_v29 }
  0x6c   : > { %729 = vmatmul.mubr.f32.gmra.mxu0 %v208_v30  ;;  %753 = vmatmul.mubr.f32.gmra.mxu1 %v224_v31 }
  0x6d   : > { %731 = vmatprep.mubr.f32.mxu0 %v209_v32  ;;  %755 = vmatprep.mubr.f32.mxu1 %v225_v33 }
  0x70   : > { %732 = vmatmul.mubr.f32.gmra.mxu0 %v210_v34  ;;  %756 = vmatmul.mubr.f32.gmra.mxu1 %v226_v35 }
  0x71   : > { %734 = vmatprep.mubr.f32.mxu0 %v211_v36  ;;  %758 = vmatprep.mubr.f32.mxu1 %v227_v37 }
  0x74   : > { %735 = vmatmul.mubr.f32.gmra.mxu0 %v212_v38  ;;  %759 = vmatmul.mubr.f32.gmra.mxu1 %v228_v39 }
  0x75   : > { %737 = vmatprep.mubr.f32.mxu0 %v213_v40  ;;  %761 = vmatprep.mubr.f32.mxu1 %v229_v41 }
  0x78   : > { %738 = vmatmul.mubr.f32.gmra.mxu0 %v214_v42  ;;  %762 = vmatmul.mubr.f32.gmra.mxu1 %v230_v43 }
  0x79   : > { %740 = vmatprep.mubr.f32.mxu0 %v215_v44  ;;  %764 = vmatprep.mubr.f32.mxu1 %v231_v45 }
  0x7c   : > { %741 = vmatmul.mubr.f32.gmra.mxu0 %v216_v46  ;;  %765 = vmatmul.mubr.f32.gmra.mxu1 %v232_v47 }
 0x120   : > { %v721_v48 = vpop.f32.mrf.mxu0  ;;  %v745_v49 = vpop.f32.mrf.mxu1 }
 0x121   : > { %475 = vst [vmem:[%s1190_s19 + $0x8] sm:$0xff] %v721_v48  ;;  %491 = vst [vmem:[%s1190_s19 + $0x88] sm:$0xff] %v745_v49 }
 0x122   : > { %v315_v50 = vpop.f32.mrf.mxu0  ;;  %v395_v51 = vpop.f32.mrf.mxu1 }
 0x123   : > { %474 = vst [vmem:[%s1190_s19] sm:$0xff] %v315_v50  ;;  %490 = vst [vmem:[%s1190_s19 + $0x80] sm:$0xff] %v395_v51 }
 0x124   : > { %v724_v52 = vpop.f32.mrf.mxu0  ;;  %v748_v53 = vpop.f32.mrf.mxu1 }
 0x125   : > { %477 = vst [vmem:[%s1190_s19 + $0x18] sm:$0xff] %v724_v52  ;;  %493 = vst [vmem:[%s1190_s19 + $0x98] sm:$0xff] %v748_v53 }
 0x126   : > { %v325_v54 = vpop.f32.mrf.mxu0  ;;  %v405_v55 = vpop.f32.mrf.mxu1 }
 0x127   : > { %476 = vst [vmem:[%s1190_s19 + $0x10] sm:$0xff] %v325_v54  ;;  %492 = vst [vmem:[%s1190_s19 + $0x90] sm:$0xff] %v405_v55 }
 0x128   : > { %v727_v56 = vpop.f32.mrf.mxu0  ;;  %v751_v57 = vpop.f32.mrf.mxu1 }
 0x129   : > { %479 = vst [vmem:[%s1190_s19 + $0x28] sm:$0xff] %v727_v56  ;;  %495 = vst [vmem:[%s1190_s19 + $0xa8] sm:$0xff] %v751_v57 }
 0x12a   : > { %v335_v58 = vpop.f32.mrf.mxu0  ;;  %v415_v59 = vpop.f32.mrf.mxu1 }
 0x12b   : > { %478 = vst [vmem:[%s1190_s19 + $0x20] sm:$0xff] %v335_v58  ;;  %494 = vst [vmem:[%s1190_s19 + $0xa0] sm:$0xff] %v415_v59 }
 0x12c   : > { %v730_v60 = vpop.f32.mrf.mxu0  ;;  %v754_v61 = vpop.f32.mrf.mxu1 }
 0x12d   : > { %481 = vst [vmem:[%s1190_s19 + $0x38] sm:$0xff] %v730_v60  ;;  %497 = vst [vmem:[%s1190_s19 + $0xb8] sm:$0xff] %v754_v61 }
 0x12e   : > { %v345_v62 = vpop.f32.mrf.mxu0  ;;  %v425_v63 = vpop.f32.mrf.mxu1 }
 0x12f   : > { %480 = vst [vmem:[%s1190_s19 + $0x30] sm:$0xff] %v345_v62  ;;  %496 = vst [vmem:[%s1190_s19 + $0xb0] sm:$0xff] %v425_v63 }
 0x130   : > { %v733_v0 = vpop.f32.mrf.mxu0  ;;  %v757_v1 = vpop.f32.mrf.mxu1 }
 0x131   : > { %483 = vst [vmem:[%s1190_s19 + $0x48] sm:$0xff] %v733_v0  ;;  %499 = vst [vmem:[%s1190_s19 + $0xc8] sm:$0xff] %v757_v1 }
 0x132   : > { %v355_v2 = vpop.f32.mrf.mxu0  ;;  %v435_v3 = vpop.f32.mrf.mxu1 }
 0x133   : > { %482 = vst [vmem:[%s1190_s19 + $0x40] sm:$0xff] %v355_v2  ;;  %498 = vst [vmem:[%s1190_s19 + $0xc0] sm:$0xff] %v435_v3 }
 0x134   : > { %v736_v4 = vpop.f32.mrf.mxu0  ;;  %v760_v5 = vpop.f32.mrf.mxu1 }
 0x135   : > { %485 = vst [vmem:[%s1190_s19 + $0x58] sm:$0xff] %v736_v4  ;;  %501 = vst [vmem:[%s1190_s19 + $0xd8] sm:$0xff] %v760_v5 }
 0x136   : > { %v365_v6 = vpop.f32.mrf.mxu0  ;;  %v445_v7 = vpop.f32.mrf.mxu1 }
 0x137   : > { %484 = vst [vmem:[%s1190_s19 + $0x50] sm:$0xff] %v365_v6  ;;  %500 = vst [vmem:[%s1190_s19 + $0xd0] sm:$0xff] %v445_v7 }
 0x138   : > { %v739_v8 = vpop.f32.mrf.mxu0  ;;  %v763_v9 = vpop.f32.mrf.mxu1 }
 0x139   : > { %487 = vst [vmem:[%s1190_s19 + $0x68] sm:$0xff] %v739_v8  ;;  %503 = vst [vmem:[%s1190_s19 + $0xe8] sm:$0xff] %v763_v9 }
 0x13a   : > { %v375_v10 = vpop.f32.mrf.mxu0  ;;  %v455_v11 = vpop.f32.mrf.mxu1 }
 0x13b   : > { %486 = vst [vmem:[%s1190_s19 + $0x60] sm:$0xff] %v375_v10  ;;  %502 = vst [vmem:[%s1190_s19 + $0xe0] sm:$0xff] %v455_v11 }
 0x13c   : > { %v742_v12 = vpop.f32.mrf.mxu0  ;;  %v766_v13 = vpop.f32.mrf.mxu1 }
 0x13d   : > { %489 = vst [vmem:[%s1190_s19 + $0x78] sm:$0xff] %v742_v12  ;;  %505 = vst [vmem:[%s1190_s19 + $0xf8] sm:$0xff] %v766_v13 }
 0x13e   : > { %v385_v14 = vpop.f32.mrf.mxu0  ;;  %v465_v15 = vpop.f32.mrf.mxu1 }
 0x13f   : > { %488 = vst [vmem:[%s1190_s19 + $0x70] sm:$0xff] %v385_v14  ;;  %504 = vst [vmem:[%s1190_s19 + $0xf0] sm:$0xff] %v465_v15 }
 0x140   : > { %943 = shalt.err (!%p940_p5)
}
 0x141   : > { %s944_s3 = scalar_lea.hbm %s1225_s26, 4096  ;;  %s948_s7 = scalar_lea.hbm %s1281_s2, 8192 }
 0x142   : > { %p945_p7 = scmp.ne.s32.totalorder %s1225_s26, %s944_s3  ;;  %p949_p9 = scmp.lt.s32.totalorder %s1225_s26, %s1281_s2 }
 0x143   : > { %p950_p11 = scmp.lt.s32.totalorder %s948_s7, %s944_s3 }
 0x144   : > { %p946_p4 = pnand %p945_p7, %p1128_p13 }
 0x145   : > { %p951_p10 = por %p950_p11, %p949_p9 }
 0x146   : > { %p947_p6 = pneg %p946_p4 }
 0x148   : > { %p952_p1 = pnand %p951_p10, %p947_p6 }
 0x14a   : > { %955 = shalt.err (!%p952_p1)
}
 0x14b   : > { %s1021_s17 = smov 128   ;;  %s1022_s19 = smov 8  }
 0x14c   : > { %805 = dma.vmem_to_hbm [thread:$0]  (%p1128_p13), %s1227_s28, 4096, %s1225_s26, %s507_s12, %s1021_s17, %s1021_s17, %s1022_s19  }
 0x14d PF: > { %s537_s21 = sand.u32 1, %s994_s9   ;;  %p1295_p8 = scmp.ne.s32.totalorder %s1287_s20, 0 }
 0x14e   : > { %p1296_p12 = scmp.ge.s32.totalorder %s1014_s14, 2  ;;  %s538_s23 = scalar_lea.sflag [#allocation4], %s537_s21 }
 0x150   : > { %p816_p0 = pnand %p1296_p12, %p1295_p8 }
 0x152   : > { %p817_p2 = pneg %p816_p0 }
 0x154   : > { %989 = dma.done.wait (%p817_p2), %s538_s23, 4096  }
 0x155   : > { %991 = vsyncadd (%p817_p2), %s538_s23, 4294963200  ;;  %s19_s14 = sadd.s32 1, %s1014_s14   ;;  %s1297_s9 = smov %s998_s10 }
 0x156   : > { %p16_p3 = scmp.ge.s32.totalorder %s19_s14, 4   ;;  %s1298_s10 = smov %s1002_s11 }
 0x157   : > { %s1299_s11 = smov %s1137_s15  ;;  %s1300_s12 = smov %s1010_s13 }
 0x158   : > { %s1301_s13 = smov %s1303_s25  ;;  %18 = sbr.rel (!%p16_p3) target bundleno = 7 (0x7), region = 79 }
 0x15d   :  { %543 = vsyncpa [#allocation3], 1 }
 0x15e   :  { %545 = vsyncpa [#allocation3 + $0x1], 1 }
 0x15f   :  { %546 = vsyncpa [#allocation6], 1 }
 0x160   :  { %548 = vsyncpa [#allocation6 + $0x1], 1 }
 0x161   :  { %549 = vsyncpa [#allocation4], 1 }
 0x162   :  { %551 = vsyncpa [#allocation4 + $0x1], 1 }

</bundles_post_ra>
